<compile_context>
chip_gen: v7x
topology: tpu7x:2x2x1
jax: 0.10.0
libtpu: 0.0.40
codegen_flags: <defaults>
</compile_context>

<pallas_src>
import functools

import jax
import jax.numpy as jnp
from jax.experimental import pallas as pl
from jax.experimental.pallas import tpu as pltpu


def _triplet_kernel(margin, split, tile_p, fl_ref, fr_ref, ll_ref, lr_ref, out_ref):
    """One row-tile of pairs -> one partial sum.

    fl_ref/fr_ref: [1, TILE_P, D] (input dtype)
    ll_ref/lr_ref: [1, TILE_P, 1] int32
    out_ref:       [1, 1] f32 partial sum for this tile
    """
    i = pl.program_id(0)

    fl = fl_ref[0].astype(jnp.float32)                         # [TILE_P, D]  (cast in VMEM)
    fr = fr_ref[0].astype(jnp.float32)
    diff = fl - fr                                             # VPU
    sq = jnp.sum(diff * diff, axis=1, keepdims=True)           # [TILE_P, 1]  (XLU lane reduce)
    dist = jnp.sqrt(sq)                                        # [TILE_P, 1]

    is_same = (ll_ref[0] == lr_ref[0]).astype(jnp.float32)     # [TILE_P, 1]
    per_row = is_same * dist + (1.0 - is_same) * jnp.maximum(margin - dist, 0.0)

    # Mask rows past the true number of pairs (last tile may be cdiv-padded).
    row = jax.lax.broadcasted_iota(jnp.int32, (tile_p, 1), 0) + i * tile_p
    per_row = jnp.where(row < split, per_row, 0.0)

    out_ref[...] = jnp.sum(per_row).reshape(1, 1)


def _choose_tile_p(split, d, itemsize):
    """Rows per tile: keep 2 feature inputs x 2 pipeline buffers under ~12 MiB
    (fits v5e's 16 MiB scoped-VMEM default and v7x's 64 MiB VMEM)."""
    if split <= 8:
        return int(split)
    budget_bytes = 12 * 1024 * 1024
    tile = budget_bytes // (4 * d * itemsize)   # 2 inputs x 2 buffers x d x itemsize
    tile = min(tile, split, 1024)
    tile = max(8, (tile // 8) * 8)              # sublane-aligned
    return int(tile)


@functools.partial(jax.jit, static_argnames=("margin",))
def triplet_loss(features, labels, margin=10.0):
    """features: [bsz, feature_dim], labels: [bsz] int. Returns scalar f32 loss."""
    bsz, d = features.shape
    split = bsz // 2

    # Contiguous view of the first 2*split rows as two stacked halves.
    # (Row-major reshape: no HBM copy; the slice is the identity for even bsz.)
    f2 = features[: 2 * split].reshape(2, split, d)
    l2 = labels[: 2 * split].reshape(2, split, 1).astype(jnp.int32)

    tile_p = _choose_tile_p(split, d, jnp.dtype(features.dtype).itemsize)
    num_tiles = pl.cdiv(split, tile_p)

    kernel = functools.partial(_triplet_kernel, float(margin), split, tile_p)

    partial = pl.pallas_call(
        kernel,
        out_shape=jax.ShapeDtypeStruct((num_tiles, 1), jnp.float32),
        grid=(num_tiles,),
        in_specs=[
            pl.BlockSpec((1, tile_p, d), lambda i: (0, i, 0)),   # left-half features
            pl.BlockSpec((1, tile_p, d), lambda i: (1, i, 0)),   # right-half features
            pl.BlockSpec((1, tile_p, 1), lambda i: (0, i, 0)),   # left-half labels
            pl.BlockSpec((1, tile_p, 1), lambda i: (1, i, 0)),   # right-half labels
        ],
        out_specs=pl.BlockSpec((1, 1), lambda i: (i, 0)),
        compiler_params=pltpu.CompilerParams(
            dimension_semantics=("parallel",)),   # independent tiles -> megacore on v7x
    )(f2, f2, l2, l2)

    # Mean over the true number of pairs (not the padded tile count).
    return jnp.sum(partial) / split


def _reference(features, labels, margin=10.0):
    bsz = features.shape[0]
    split = bsz // 2
    fl, fr = features[:split], features[split:2 * split]
    dist = jnp.linalg.norm(fl.astype(jnp.float32) - fr.astype(jnp.float32), axis=1)
    is_same = (labels[:split] == labels[split:2 * split]).astype(jnp.float32)
    pos = is_same * dist
    neg = (1.0 - is_same) * jnp.maximum(margin - dist, 0.0)
    return jnp.mean(pos + neg)


if __name__ == "__main__":
    key = jax.random.PRNGKey(0)
    k1, k2, k3, k4 = jax.random.split(key, 4)

    # Case 1: tiny shape consistent with the module's [bsz, feature_dim] input.
    bsz, feature_dim = 8, 32
    features = jax.random.normal(k1, (bsz, feature_dim), dtype=jnp.float32)
    labels = jax.random.randint(k2, (bsz,), 0, 3, dtype=jnp.int32)
    loss = jax.block_until_ready(triplet_loss(features, labels, margin=10.0))
    ref = _reference(features, labels, margin=10.0)
    assert jnp.allclose(loss, ref, rtol=1e-5, atol=1e-5), (loss, ref)

    # Case 2: exercises the row-tiled path with a cdiv-padded remainder tile
    # (split=20 -> tile_p=16 -> 2 tiles, last one partially masked).
    bsz2, feature_dim2 = 40, 128
    features2 = jax.random.normal(k3, (bsz2, feature_dim2), dtype=jnp.float32)
    labels2 = jax.random.randint(k4, (bsz2,), 0, 3, dtype=jnp.int32)
    loss2 = jax.block_until_ready(triplet_loss(features2, labels2, margin=10.0))
    ref2 = _reference(features2, labels2, margin=10.0)
    assert jnp.allclose(loss2, ref2, rtol=1e-5, atol=1e-5), (loss2, ref2)

    print("KERNEL_OK")
</pallas_src>

<mosaic_0001>
module attributes {stable_mosaic.version = 11 : i64} {
  func.func @_triplet_kernel(%arg0: i32, %arg1: memref<1x4x32xf32, #tpu.memory_space<vmem>>, %arg2: memref<1x4x32xf32, #tpu.memory_space<vmem>>, %arg3: memref<1x4x1xi32, #tpu.memory_space<vmem>>, %arg4: memref<1x4x1xi32, #tpu.memory_space<vmem>>, %arg5: memref<1x1xf32, #tpu.memory_space<vmem>>) attributes {dimension_semantics = [#tpu.dimension_semantics<parallel>], iteration_bounds = array<i64: 1>, scalar_prefetch = 0 : i64, scratch_operands = 0 : i64, tpu.core_type = #tpu.core_type<tc>, window_params = [{transform_indices = @transform_0, window_bounds = array<i64: 1, 4, 32>}, {transform_indices = @transform_1, window_bounds = array<i64: 1, 4, 32>}, {transform_indices = @transform_2, window_bounds = array<i64: 1, 4, 1>}, {transform_indices = @transform_3, window_bounds = array<i64: 1, 4, 1>}, {transform_indices = @transform_4, window_bounds = array<i64: 1, 1>}]} {
    %c0 = arith.constant 0 : index
    %c0_0 = arith.constant 0 : index
    %c0_1 = arith.constant 0 : index
    %0 = vector.load %arg1[%c0, %c0_0, %c0_1] : memref<1x4x32xf32, #tpu.memory_space<vmem>>, vector<1x4x32xf32>
    %1 = vector.shape_cast %0 : vector<1x4x32xf32> to vector<4x32xf32>
    %c0_2 = arith.constant 0 : index
    %c0_3 = arith.constant 0 : index
    %c0_4 = arith.constant 0 : index
    %2 = vector.load %arg2[%c0_2, %c0_3, %c0_4] : memref<1x4x32xf32, #tpu.memory_space<vmem>>, vector<1x4x32xf32>
    %3 = vector.shape_cast %2 : vector<1x4x32xf32> to vector<4x32xf32>
    %4 = arith.subf %1, %3 : vector<4x32xf32>
    %5 = arith.mulf %4, %4 : vector<4x32xf32>
    %cst = arith.constant dense<0.000000e+00> : vector<4xf32>
    %6 = vector.multi_reduction <add>, %5, %cst [1] : vector<4x32xf32> to vector<4xf32>
    %7 = vector.shape_cast %6 : vector<4xf32> to vector<4x1xf32>
    %8 = math.sqrt %7 : vector<4x1xf32>
    %c0_5 = arith.constant 0 : index
    %c0_6 = arith.constant 0 : index
    %c0_7 = arith.constant 0 : index
    %9 = vector.load %arg3[%c0_5, %c0_6, %c0_7] : memref<1x4x1xi32, #tpu.memory_space<vmem>>, vector<1x4x1xi32>
    %10 = vector.shape_cast %9 : vector<1x4x1xi32> to vector<4x1xi32>
    %c0_8 = arith.constant 0 : index
    %c0_9 = arith.constant 0 : index
    %c0_10 = arith.constant 0 : index
    %11 = vector.load %arg4[%c0_8, %c0_9, %c0_10] : memref<1x4x1xi32, #tpu.memory_space<vmem>>, vector<1x4x1xi32>
    %12 = vector.shape_cast %11 : vector<1x4x1xi32> to vector<4x1xi32>
    %13 = arith.cmpi eq, %10, %12 : vector<4x1xi32>
    %14 = arith.extui %13 : vector<4x1xi1> to vector<4x1xi32>
    %15 = arith.sitofp %14 : vector<4x1xi32> to vector<4x1xf32>
    %16 = arith.mulf %15, %8 : vector<4x1xf32>
    %cst_11 = arith.constant 1.000000e+00 : f32
    %17 = vector.broadcast %cst_11 : f32 to vector<4x1xf32>
    %18 = arith.subf %17, %15 : vector<4x1xf32>
    %cst_12 = arith.constant 1.000000e+01 : f32
    %19 = vector.broadcast %cst_12 : f32 to vector<4x1xf32>
    %20 = arith.subf %19, %8 : vector<4x1xf32>
    %cst_13 = arith.constant 0.000000e+00 : f32
    %21 = vector.broadcast %cst_13 : f32 to vector<4x1xf32>
    %22 = arith.maximumf %20, %21 : vector<4x1xf32>
    %23 = arith.mulf %18, %22 : vector<4x1xf32>
    %24 = arith.addf %16, %23 : vector<4x1xf32>
    %25 = tpu.iota {dimensions = array<i32: 0>} : vector<4x1xi32>
    %c4_i32 = arith.constant 4 : i32
    %26 = arith.muli %arg0, %c4_i32 : i32
    %27 = vector.broadcast %26 : i32 to vector<4x1xi32>
    %28 = arith.addi %25, %27 : vector<4x1xi32>
    %c4_i32_14 = arith.constant 4 : i32
    %29 = vector.broadcast %c4_i32_14 : i32 to vector<4x1xi32>
    %30 = arith.cmpi slt, %28, %29 : vector<4x1xi32>
    %cst_15 = arith.constant 0.000000e+00 : f32
    %31 = vector.broadcast %cst_15 : f32 to vector<4x1xf32>
    %32 = arith.select %30, %24, %31 : vector<4x1xi1>, vector<4x1xf32>
    %33 = vector.shape_cast %32 : vector<4x1xf32> to vector<1x4x1xf32>
    %cst_16 = arith.constant dense<0.000000e+00> : vector<1xf32>
    %34 = vector.multi_reduction <add>, %33, %cst_16 [1, 2] : vector<1x4x1xf32> to vector<1xf32>
    %35 = vector.shape_cast %34 : vector<1xf32> to vector<1x1x1xf32>
    %36 = vector.extract %35[0, 0, 0] : f32 from vector<1x1x1xf32>
    %37 = vector.broadcast %36 : f32 to vector<1x1xf32>
    %c0_17 = arith.constant 0 : index
    %c0_18 = arith.constant 0 : index
    %38 = vector.load %arg5[%c0_17, %c0_18] : memref<1x1xf32, #tpu.memory_space<vmem>>, vector<1x1xf32>
    tpu.vector_store %arg5[%c0_17, %c0_18], %37 {strides = array<i32>} : memref<1x1xf32, #tpu.memory_space<vmem>>, vector<1x1xf32>,
    return
  }
  func.func @transform_0(%arg0: i32) -> (i32, i32, i32) {
    %c0_i32 = arith.constant 0 : i32
    %c0_i32_0 = arith.constant 0 : i32
    %c0_i32_1 = arith.constant 0 : i32
    return %c0_i32, %arg0, %c0_i32_0 : i32, i32, i32
  }
  func.func @transform_1(%arg0: i32) -> (i32, i32, i32) {
    %c1_i32 = arith.constant 1 : i32
    %c0_i32 = arith.constant 0 : i32
    %c0_i32_0 = arith.constant 0 : i32
    return %c1_i32, %arg0, %c0_i32 : i32, i32, i32
  }
  func.func @transform_2(%arg0: i32) -> (i32, i32, i32) {
    %c0_i32 = arith.constant 0 : i32
    %c0_i32_0 = arith.constant 0 : i32
    %c0_i32_1 = arith.constant 0 : i32
    return %c0_i32, %arg0, %c0_i32_0 : i32, i32, i32
  }
  func.func @transform_3(%arg0: i32) -> (i32, i32, i32) {
    %c1_i32 = arith.constant 1 : i32
    %c0_i32 = arith.constant 0 : i32
    %c0_i32_0 = arith.constant 0 : i32
    return %c1_i32, %arg0, %c0_i32 : i32, i32, i32
  }
  func.func @transform_4(%arg0: i32) -> (i32, i32) {
    %c0_i32 = arith.constant 0 : i32
    %c0_i32_0 = arith.constant 0 : i32
    return %arg0, %c0_i32 : i32, i32
  }
}

</mosaic_0001>

<bundles_post_ra>
// kernel: triplet_loss.1
= control target key start
LH: loop header
LB: loop body
LE: loop exit
PB: predicated region body
PF: predicated region fallthrough
CT: control target
= control target key end

     0   :  { %s169_s0 = inlined_call_operand.vmem [shape: f32[2,4,32], index: 0, kind: input, shape index: {}, may-alias: {0,1}]   ;;  %s170_s1 = inlined_call_operand.vmem [shape: f32[2,4,32], index: 1, kind: input, shape index: {}, may-alias: {0,1}]   ;;  %s171_s2 = inlined_call_operand.vmem [shape: s32[2,4,1], index: 2, kind: input, shape index: {}, may-alias: {2,3}]   ;;  %s172_s3 = inlined_call_operand.vmem [shape: s32[2,4,1], index: 3, kind: input, shape index: {}, may-alias: {2,3}]   ;;  %s173_s4 = inlined_call_operand.hbm [shape: f32[1,1], index: 4, kind: output, shape index: {}]  }
   0x1   :  { %v24_v0 = vld [vmem:[%s169_s0] sm:$0xf]  ;;  %v85_v1 = vld [vmem:[%s170_s1 + $0x4] sm:$0xf] }
   0x2   :  { %v26_v2 = vsub.f32 %v24_v0, %v85_v1 }
   0x3   :  { %9 = vsyncpa [#allocation3], 0  ;;  %vm28_vm0 = vcmask 257024   ;;  %v39_v6 = vld [vmem:[%s171_s2] sm:$0xf]  ;;  %v50_v11 = vlaneseq  ;;  %v118_v14 = vmov 0.0  }
   0x4   :  { %v27_v3 = vmul.f32 %v26_v2, %v26_v2  ;;  %v86_v7 = vld [vmem:[%s172_s3 + $0x4] sm:$0xf]  ;;  %vm57_vm5 = vcmask 3072   ;;  %s119_s0 = smov [#allocation2]   ;;  %vm69_vm6 = vcmask 0  }
   0x5   :  { %vm41_vm1 = vcmp.eq.s32.totalorder %v39_v6, %v86_v7  ;;  %v51_v18 = vshrl.u32 %v50_v11, 7  ;;  %s77_s1 = sshll.u32 %s119_s0, 4  ;;  %s78_s1 = int_to_ptr.vmem [resolvable:$true] %s77_s1 }
   0x6   :  { %v29_v4 = vsel %vm28_vm0, %v27_v3, 0.0  ;;  %v87_v15 = vsel %vm41_vm1, 1.0, %v118_v14  ;;  %s94_s3 = scalar_lea.vmem %s78_s1, 16  ;;  %s98_s23 = scalar_lea.vmem %s78_s1, 32 }
   0x7   :  { %30 = vadd.xlane.f32.xlu0 %v29_v4  ;;  %v45_v16 = vsub.f32 1.0, %v87_v15  ;;  %vm55_vm4 = vcmp.lt.s32.totalorder %v51_v18, 4  ;;  %p95_p0 = scmp.ne.s32.totalorder %s78_s1, %s94_s3  ;;  %p99_p1 = scmp.lt.s32.totalorder %s78_s1, %s78_s1 }
   0x8   :  { %p100_p2 = scmp.lt.s32.totalorder %s98_s23, %s94_s3 }
   0xa   :  { %p101_p3 = por %p100_p2, %p99_p1 }
   0xc   :  { %p102_p4 = pnand %p101_p3, %p95_p0 }
  0x94   :  { %v31_v5 = vpop.xlane.xlu0 %30 }
  0x95   :  { %92 = vrsqrt.f32 %v31_v5  ;;  %vm34_vm2 = vcmp.eq.f32.partialorder %v31_v5, inf  ;;  %v37_v10 = vand.u32 2147483648, %v31_v5  ;;  %vm36_vm3 = vcmp.eq.f32.partialorder %v31_v5, 0.0 }
  0x9f   :  { %v93_v8 = vpop.eup %92 }
  0xa0   :  { %v33_v9 = vmul.f32 %v93_v8, %v31_v5 }
  0xa2   :  { %v35_v12 = vsel %vm34_vm2, %v31_v5, %v33_v9 }
  0xa3   :  { %v38_v13 = vsel %vm36_vm3, %v37_v10, %v35_v12 }
  0xa4   :  { %v46_v17 = vsub.f32 10.0, %v38_v13  ;;  %v44_v20 = vmul.f32 %v87_v15, %v38_v13 }
  0xa6   :  { %v47_v19 = vmax.f32 %v46_v17, 0.0 }
  0xa8   :  { %v48_v21 = vmul.f32 %v47_v19, %v45_v16 }
  0xaa   :  { %v49_v22 = vadd.f32 %v48_v21, %v44_v20 }
  0xac   :  { %v56_v23 = vsel %vm55_vm4, %v49_v22, 0.0 }
  0xad   :  { %v58_v24 = vsel %vm57_vm5, %v56_v23, 0.0 }
  0xae   :  { %59 = vadd.xlane.f32.xlu0 %v58_v24 }
 0x13b   :  { %v60_v25 = vpop.xlane.xlu0 %59 }
 0x13c   :  { %v61_v26 = vrot.slane %v60_v25, 4 }
 0x13e   :  { %v62_v27 = vadd.f32 %v61_v26, %v60_v25 }
 0x140   :  { %v63_v28 = vrot.slane %v62_v27, 2 }
 0x142   :  { %v64_v29 = vadd.f32 %v63_v28, %v62_v27 }
 0x144   :  { %v65_v30 = vrot.slane %v64_v29, 1 }
 0x146   :  { %v66_v31 = vadd.f32 %v65_v30, %v64_v29 }
 0x148   :  { %88 = vpush %v66_v31 }
 0x179   :  { %s89_s2 = spop %88 }
 0x17a   :  { %v68_v32 = vstv %s89_s2 }
 0x17b   :  { %70 = vst.msk [vmem:[#allocation2] sm:$0x1] %vm69_vm6, %v68_v32 }
 0x17c   :  { %105 = shalt.err (!%p102_p4)
}
 0x17d   :  { %s106_s26 = scalar_lea.hbm %s173_s4, 16 }
 0x17e   :  { %p107_p5 = scmp.ne.s32.totalorder %s173_s4, %s106_s26  ;;  %p110_p6 = scmp.lt.u32.totalorder %s106_s26, %s173_s4 }
 0x180   :  { %p112_p7 = pnand %p110_p6, %p107_p5 }
 0x182   :  { %115 = shalt.err (!%p112_p7)
}
 0x183   :  { %80 = dma.vmem_to_hbm [thread:$0]  %s78_s1, 16, %s173_s4, [#allocation3]  }
 0x184   :  { %116 = dma.done.wait [#allocation3], 16  }
 0x185   :  { %117 = vsyncadd [#allocation3], 4294967280 }
 0x186   :  { %84 = vsyncpa [#allocation3], 1 }

</bundles_post_ra>
